<compile_context>
chip_gen: v7x
topology: tpu7x:2x2x1
jax: 0.10.0
libtpu: 0.0.40
codegen_flags: <defaults>
</compile_context>

<pallas_src>
import math
import functools

import jax
import jax.numpy as jnp
from jax.experimental import pallas as pl
from jax.experimental.pallas import tpu as pltpu


# ----------------------------- helpers ------------------------------------ #
def _softplus(x):
    # numerically stable softplus (avoids exp overflow even in untaken branch)
    return jnp.where(x > 20.0, x, jnp.log1p(jnp.exp(jnp.minimum(x, 20.0))))


def _mish(x):
    # Mish(x) = x * tanh(softplus(x))
    return x * jnp.tanh(_softplus(x))


# --------------------------- fused forward kernel -------------------------- #
def _fused_kernel(*refs, num_layers, cond_predict_scale):
    """Inputs (per grid step b):
       t(1,1), freqs(1,half), enc_w1, enc_b1, enc_w2, enc_b2,
       gcond(1,C), x(T,Din),
       per layer: fw, fb [+ sw, sb, bw, bb  if cond_predict_scale else cw, cb],
       final_w, final_b  -> out(T,Dout)
    """
    f32, bf16 = jnp.float32, jnp.bfloat16
    t_ref, fr_ref, ew1, eb1, ew2, eb2, gc_ref, x_ref = refs[:8]
    per = 6 if cond_predict_scale else 4
    lrefs = refs[8:8 + num_layers * per]
    fwf_ref, fbf_ref, o_ref = refs[8 + num_layers * per:]

    # ---- diffusion step encoder (tiny, recomputed per batch row) ----
    emb = t_ref[...] * fr_ref[...]                                    # (1, half)
    se = jnp.concatenate([jnp.sin(emb), jnp.cos(emb)], axis=-1)       # (1, dsed)
    h = jnp.dot(se.astype(bf16), ew1[...], preferred_element_type=f32) + eb1[...]
    h = _mish(h)
    gfeat = jnp.dot(h.astype(bf16), ew2[...], preferred_element_type=f32) + eb2[...]

    # ---- condition path: hoisted mish(cond), computed once ----
    cond = jnp.concatenate([gfeat, gc_ref[...]], axis=-1)             # (1, C)
    mc = _mish(cond).astype(bf16)

    # ---- FiLM layers, activation stays resident (VMEM/vregs) ----
    act = x_ref[...]                                                  # (T, Din) bf16
    for i in range(num_layers):
        o = i * per
        fw, fb = lrefs[o], lrefs[o + 1]
        out = jnp.dot(act, fw[...], preferred_element_type=f32) + fb[...]   # (T, H) f32
        if cond_predict_scale:
            sw, sb, bw, bb = lrefs[o + 2:o + 6]
            scale = jnp.dot(mc, sw[...], preferred_element_type=f32) + sb[...]  # (1, H)
            bias = jnp.dot(mc, bw[...], preferred_element_type=f32) + bb[...]   # (1, H)
            out = scale * out + bias          # broadcast over T rows on VPU
        else:
            cw, cb = lrefs[o + 2], lrefs[o + 3]
            e = jnp.dot(mc, cw[...], preferred_element_type=f32) + cb[...]
            out = out + e
        act = out.astype(bf16)

    y = jnp.dot(act, fwf_ref[...], preferred_element_type=f32) + fbf_ref[...]
    o_ref[...] = y.astype(o_ref.dtype)


def conditional_mlp_forward(params, x, timestep, global_cond, *, dsed, cond_predict_scale):
    B, T, Din = x.shape
    H = params["layers"][0][0].shape[1]
    num_layers = len(params["layers"])
    half = dsed // 2

    freqs = jnp.exp(
        jnp.arange(half, dtype=jnp.float32) * -(math.log(10000.0) / (half - 1))
    ).reshape(1, half)
    t3 = jnp.full((B, 1, 1), timestep, jnp.float32)          # scalar timestep -> per batch
    gc3 = global_cond.astype(jnp.float32).reshape(B, 1, -1)
    x_bf = x.astype(jnp.bfloat16)

    def wcast(w):
        return w.astype(jnp.bfloat16)

    def brow(b):
        return b.astype(jnp.float32).reshape(1, -1)

    args, in_specs = [], []

    def add(a, spec):
        args.append(a)
        in_specs.append(spec)

    def full_block(a):
        return pl.BlockSpec(a.shape, lambda b: (0,) * a.ndim)

    add(t3, pl.BlockSpec((None, 1, 1), lambda b: (b, 0, 0)))
    add(freqs, full_block(freqs))
    for name in ("enc_w1", "enc_b1", "enc_w2", "enc_b2"):
        a = wcast(params[name]) if name.endswith("w1") or name.endswith("w2") else brow(params[name])
        add(a, full_block(a))
    add(gc3, pl.BlockSpec((None, 1, gc3.shape[-1]), lambda b: (b, 0, 0)))
    add(x_bf, pl.BlockSpec((None, T, Din), lambda b: (b, 0, 0)))

    for (fw, fb, cw, cb) in params["layers"]:
        for a in (wcast(fw), brow(fb)):
            add(a, full_block(a))
        if cond_predict_scale:
            # split combined (C, 2H) cond weight into scale / bias halves (lane-clean)
            for a in (wcast(cw[:, :H]), brow(cb[:H]), wcast(cw[:, H:]), brow(cb[H:])):
                add(a, full_block(a))
        else:
            for a in (wcast(cw), brow(cb)):
                add(a, full_block(a))

    for a in (wcast(params["final_w"]), brow(params["final_b"])):
        add(a, full_block(a))

    kern = functools.partial(
        _fused_kernel, num_layers=num_layers, cond_predict_scale=cond_predict_scale
    )
    Dout = params["final_w"].shape[1]
    out = pl.pallas_call(
        kern,
        grid=(B,),
        out_shape=jax.ShapeDtypeStruct((B, T, Dout), jnp.float32),
        in_specs=in_specs,
        out_specs=pl.BlockSpec((None, T, Dout), lambda b: (b, 0, 0)),
        compiler_params=pltpu.CompilerParams(dimension_semantics=("parallel",)),
    )(*args)
    return out


# ------------------------ parameters (deterministic) ----------------------- #
def init_params(key, input_dim, num_layers, cond_dim, dsed, hidden, cond_predict_scale):
    def lin(k, din, dout):
        k1, k2 = jax.random.split(k)
        return (jax.random.normal(k1, (din, dout), jnp.float32) * 0.05,
                jax.random.normal(k2, (dout,), jnp.float32) * 0.05)

    keys = jax.random.split(key, 3 + 2 * num_layers)
    params = {}
    params["enc_w1"], params["enc_b1"] = lin(keys[0], dsed, dsed * 4)
    params["enc_w2"], params["enc_b2"] = lin(keys[1], dsed * 4, dsed)
    total_cond = dsed + cond_dim
    layers = []
    for i in range(num_layers):
        din = input_dim if i == 0 else hidden
        fw, fb = lin(keys[2 + 2 * i], din, hidden)
        hc = hidden * 2 if cond_predict_scale else hidden
        cw, cb = lin(keys[3 + 2 * i], total_cond, hc)
        layers.append((fw, fb, cw, cb))
    params["layers"] = layers
    params["final_w"], params["final_b"] = lin(keys[2 + 2 * num_layers], hidden, input_dim)
    return params


# ------------------------- pure-JAX reference ------------------------------ #
# Mirrors the kernel numerics exactly: bf16 MXU inputs, f32 accumulation,
# f32 elementwise (same math as the torch module up to bf16 matmul rounding).
def reference_forward(params, x, timestep, global_cond, *, dsed, cond_predict_scale):
    bf16, f32 = jnp.bfloat16, jnp.float32

    def mm(a, w):
        return jnp.dot(a.astype(bf16), w.astype(bf16), preferred_element_type=f32)

    B, T, _ = x.shape
    half = dsed // 2
    freqs = jnp.exp(jnp.arange(half, dtype=f32) * -(math.log(10000.0) / (half - 1)))
    t = jnp.full((B,), timestep, f32)
    emb = t[:, None] * freqs[None, :]
    se = jnp.concatenate([jnp.sin(emb), jnp.cos(emb)], axis=-1)
    h = _mish(mm(se, params["enc_w1"]) + params["enc_b1"])
    gfeat = mm(h, params["enc_w2"]) + params["enc_b2"]
    cond = jnp.concatenate([gfeat, global_cond.astype(f32)], axis=-1)
    mc = _mish(cond)

    out = x
    for (fw, fb, cw, cb) in params["layers"]:
        o = mm(out.reshape(B * T, -1), fw).reshape(B, T, -1) + fb
        e = (mm(mc, cw) + cb)[:, None, :]
        if cond_predict_scale:
            H = fw.shape[1]
            out = e[..., :H] * o + e[..., H:]
        else:
            out = o + e
    return mm(out.reshape(B * T, -1), params["final_w"]).reshape(B, T, -1) + params["final_b"]


# --------------------------------- main ------------------------------------ #
if __name__ == "__main__":
    B, T = 2, 8
    input_dim, cond_dim = 16, 8
    dsed, hidden, num_layers = 32, 64, 2
    timestep = 7

    key = jax.random.PRNGKey(0)
    kx, kc, kp1, kp2 = jax.random.split(key, 4)
    x = jax.random.normal(kx, (B, T, input_dim), jnp.float32)
    global_cond = jax.random.normal(kc, (B, cond_dim), jnp.float32)

    for cps, kp in ((False, kp1), (True, kp2)):
        params = init_params(kp, input_dim, num_layers, cond_dim, dsed, hidden, cps)
        out = conditional_mlp_forward(params, x, timestep, global_cond,
                                      dsed=dsed, cond_predict_scale=cps)
        out = jax.block_until_ready(out)
        ref = reference_forward(params, x, timestep, global_cond,
                                dsed=dsed, cond_predict_scale=cps)
        assert out.shape == (B, T, input_dim)
        assert jnp.allclose(out, ref, atol=1e-3, rtol=1e-3), f"mismatch (cps={cps})"

    print("KERNEL_OK")
</pallas_src>

<mosaic_0001>
module attributes {stable_mosaic.version = 11 : i64} {
  func.func @_fused_kernel(%arg0: i32, %arg1: memref<1x1x1xf32, #tpu.memory_space<vmem>>, %arg2: memref<1x16xf32, #tpu.memory_space<vmem>>, %arg3: memref<32x128xbf16, #tpu.memory_space<vmem>>, %arg4: memref<1x128xf32, #tpu.memory_space<vmem>>, %arg5: memref<128x32xbf16, #tpu.memory_space<vmem>>, %arg6: memref<1x32xf32, #tpu.memory_space<vmem>>, %arg7: memref<1x1x8xf32, #tpu.memory_space<vmem>>, %arg8: memref<1x8x16xbf16, #tpu.memory_space<vmem>>, %arg9: memref<16x64xbf16, #tpu.memory_space<vmem>>, %arg10: memref<1x64xf32, #tpu.memory_space<vmem>>, %arg11: memref<40x64xbf16, #tpu.memory_space<vmem>>, %arg12: memref<1x64xf32, #tpu.memory_space<vmem>>, %arg13: memref<64x64xbf16, #tpu.memory_space<vmem>>, %arg14: memref<1x64xf32, #tpu.memory_space<vmem>>, %arg15: memref<40x64xbf16, #tpu.memory_space<vmem>>, %arg16: memref<1x64xf32, #tpu.memory_space<vmem>>, %arg17: memref<64x16xbf16, #tpu.memory_space<vmem>>, %arg18: memref<1x16xf32, #tpu.memory_space<vmem>>, %arg19: memref<1x8x16xf32, #tpu.memory_space<vmem>>) attributes {dimension_semantics = [#tpu.dimension_semantics<parallel>], iteration_bounds = array<i64: 2>, scalar_prefetch = 0 : i64, scratch_operands = 0 : i64, tpu.core_type = #tpu.core_type<tc>, window_params = [{transform_indices = @transform_0, window_bounds = array<i64: 1, 1, 1>}, {pipeline_mode = #tpu.pipeline_mode<synchronous>, transform_indices = @transform_1, window_bounds = array<i64: 1, 16>}, {pipeline_mode = #tpu.pipeline_mode<synchronous>, transform_indices = @transform_2, window_bounds = array<i64: 32, 128>}, {pipeline_mode = #tpu.pipeline_mode<synchronous>, transform_indices = @transform_3, window_bounds = array<i64: 1, 128>}, {pipeline_mode = #tpu.pipeline_mode<synchronous>, transform_indices = @transform_4, window_bounds = array<i64: 128, 32>}, {pipeline_mode = #tpu.pipeline_mode<synchronous>, transform_indices = @transform_5, window_bounds = array<i64: 1, 32>}, {transform_indices = @transform_6, window_bounds = array<i64: 1, 1, 8>}, {transform_indices = @transform_7, window_bounds = array<i64: 1, 8, 16>}, {pipeline_mode = #tpu.pipeline_mode<synchronous>, transform_indices = @transform_8, window_bounds = array<i64: 16, 64>}, {pipeline_mode = #tpu.pipeline_mode<synchronous>, transform_indices = @transform_9, window_bounds = array<i64: 1, 64>}, {pipeline_mode = #tpu.pipeline_mode<synchronous>, transform_indices = @transform_10, window_bounds = array<i64: 40, 64>}, {pipeline_mode = #tpu.pipeline_mode<synchronous>, transform_indices = @transform_11, window_bounds = array<i64: 1, 64>}, {pipeline_mode = #tpu.pipeline_mode<synchronous>, transform_indices = @transform_12, window_bounds = array<i64: 64, 64>}, {pipeline_mode = #tpu.pipeline_mode<synchronous>, transform_indices = @transform_13, window_bounds = array<i64: 1, 64>}, {pipeline_mode = #tpu.pipeline_mode<synchronous>, transform_indices = @transform_14, window_bounds = array<i64: 40, 64>}, {pipeline_mode = #tpu.pipeline_mode<synchronous>, transform_indices = @transform_15, window_bounds = array<i64: 1, 64>}, {pipeline_mode = #tpu.pipeline_mode<synchronous>, transform_indices = @transform_16, window_bounds = array<i64: 64, 16>}, {pipeline_mode = #tpu.pipeline_mode<synchronous>, transform_indices = @transform_17, window_bounds = array<i64: 1, 16>}, {transform_indices = @transform_18, window_bounds = array<i64: 1, 8, 16>}]} {
    %c0 = arith.constant 0 : index
    %c0_0 = arith.constant 0 : index
    %c0_1 = arith.constant 0 : index
    %0 = vector.load %arg1[%c0, %c0_0, %c0_1] : memref<1x1x1xf32, #tpu.memory_space<vmem>>, vector<1x1x1xf32>
    %1 = vector.shape_cast %0 : vector<1x1x1xf32> to vector<1x1xf32>
    %c0_2 = arith.constant 0 : index
    %c0_3 = arith.constant 0 : index
    %2 = vector.load %arg2[%c0_2, %c0_3] : memref<1x16xf32, #tpu.memory_space<vmem>>, vector<1x16xf32>
    %3 = vector.broadcast %1 : vector<1x1xf32> to vector<1x16xf32>
    %4 = arith.mulf %3, %2 : vector<1x16xf32>
    %5 = math.sin %4 : vector<1x16xf32>
    %6 = math.cos %4 : vector<1x16xf32>
    %7 = tpu.concatenate %5, %6 in 1 : vector<1x16xf32>, vector<1x16xf32> -> vector<1x32xf32>
    %8 = arith.truncf %7 : vector<1x32xf32> to vector<1x32xbf16>
    %c0_4 = arith.constant 0 : index
    %c0_5 = arith.constant 0 : index
    %9 = vector.load %arg3[%c0_4, %c0_5] : memref<32x128xbf16, #tpu.memory_space<vmem>>, vector<32x128xbf16>
    %cst = arith.constant dense<0.000000e+00> : vector<1x128xf32>
    %10 = tpu.matmul %8, %9, %cst {dimension_numbers = #tpu.dot_dimension_numbers<[1], [0], [0], [1], [0, 0, 1, 1], [], []>} : vector<1x32xbf16>, vector<32x128xbf16>, vector<1x128xf32> -> vector<1x128xf32>
    %c0_6 = arith.constant 0 : index
    %c0_7 = arith.constant 0 : index
    %11 = vector.load %arg4[%c0_6, %c0_7] : memref<1x128xf32, #tpu.memory_space<vmem>>, vector<1x128xf32>
    %12 = arith.addf %10, %11 : vector<1x128xf32>
    %cst_8 = arith.constant 2.000000e+01 : f32
    %13 = vector.broadcast %cst_8 : f32 to vector<1x128xf32>
    %14 = arith.cmpf ogt, %12, %13 : vector<1x128xf32>
    %cst_9 = arith.constant 2.000000e+01 : f32
    %15 = vector.broadcast %cst_9 : f32 to vector<1x128xf32>
    %16 = arith.minimumf %12, %15 : vector<1x128xf32>
    %17 = math.exp %16 : vector<1x128xf32>
    %18 = math.log1p %17 : vector<1x128xf32>
    %19 = arith.select %14, %12, %18 : vector<1x128xi1>, vector<1x128xf32>
    %20 = math.tanh %19 : vector<1x128xf32>
    %21 = arith.mulf %12, %20 : vector<1x128xf32>
    %22 = arith.truncf %21 : vector<1x128xf32> to vector<1x128xbf16>
    %c0_10 = arith.constant 0 : index
    %c0_11 = arith.constant 0 : index
    %23 = vector.load %arg5[%c0_10, %c0_11] : memref<128x32xbf16, #tpu.memory_space<vmem>>, vector<128x32xbf16>
    %cst_12 = arith.constant dense<0.000000e+00> : vector<1x32xf32>
    %24 = tpu.matmul %22, %23, %cst_12 {dimension_numbers = #tpu.dot_dimension_numbers<[1], [0], [0], [1], [0, 0, 1, 1], [], []>} : vector<1x128xbf16>, vector<128x32xbf16>, vector<1x32xf32> -> vector<1x32xf32>
    %c0_13 = arith.constant 0 : index
    %c0_14 = arith.constant 0 : index
    %25 = vector.load %arg6[%c0_13, %c0_14] : memref<1x32xf32, #tpu.memory_space<vmem>>, vector<1x32xf32>
    %26 = arith.addf %24, %25 : vector<1x32xf32>
    %c0_15 = arith.constant 0 : index
    %c0_16 = arith.constant 0 : index
    %c0_17 = arith.constant 0 : index
    %27 = vector.load %arg7[%c0_15, %c0_16, %c0_17] : memref<1x1x8xf32, #tpu.memory_space<vmem>>, vector<1x1x8xf32>
    %28 = vector.shape_cast %27 : vector<1x1x8xf32> to vector<1x8xf32>
    %29 = tpu.concatenate %26, %28 in 1 : vector<1x32xf32>, vector<1x8xf32> -> vector<1x40xf32>
    %cst_18 = arith.constant 2.000000e+01 : f32
    %30 = vector.broadcast %cst_18 : f32 to vector<1x40xf32>
    %31 = arith.cmpf ogt, %29, %30 : vector<1x40xf32>
    %cst_19 = arith.constant 2.000000e+01 : f32
    %32 = vector.broadcast %cst_19 : f32 to vector<1x40xf32>
    %33 = arith.minimumf %29, %32 : vector<1x40xf32>
    %34 = math.exp %33 : vector<1x40xf32>
    %35 = math.log1p %34 : vector<1x40xf32>
    %36 = arith.select %31, %29, %35 : vector<1x40xi1>, vector<1x40xf32>
    %37 = math.tanh %36 : vector<1x40xf32>
    %38 = arith.mulf %29, %37 : vector<1x40xf32>
    %39 = arith.truncf %38 : vector<1x40xf32> to vector<1x40xbf16>
    %c0_20 = arith.constant 0 : index
    %c0_21 = arith.constant 0 : index
    %c0_22 = arith.constant 0 : index
    %40 = vector.load %arg8[%c0_20, %c0_21, %c0_22] : memref<1x8x16xbf16, #tpu.memory_space<vmem>>, vector<1x8x16xbf16>
    %41 = vector.shape_cast %40 : vector<1x8x16xbf16> to vector<8x16xbf16>
    %c0_23 = arith.constant 0 : index
    %c0_24 = arith.constant 0 : index
    %42 = vector.load %arg9[%c0_23, %c0_24] : memref<16x64xbf16, #tpu.memory_space<vmem>>, vector<16x64xbf16>
    %cst_25 = arith.constant dense<0.000000e+00> : vector<8x64xf32>
    %43 = tpu.matmul %41, %42, %cst_25 {dimension_numbers = #tpu.dot_dimension_numbers<[1], [0], [0], [1], [0, 0, 1, 1], [], []>} : vector<8x16xbf16>, vector<16x64xbf16>, vector<8x64xf32> -> vector<8x64xf32>
    %c0_26 = arith.constant 0 : index
    %c0_27 = arith.constant 0 : index
    %44 = vector.load %arg10[%c0_26, %c0_27] : memref<1x64xf32, #tpu.memory_space<vmem>>, vector<1x64xf32>
    %45 = vector.broadcast %44 : vector<1x64xf32> to vector<8x64xf32>
    %46 = arith.addf %43, %45 : vector<8x64xf32>
    %c0_28 = arith.constant 0 : index
    %c0_29 = arith.constant 0 : index
    %47 = vector.load %arg11[%c0_28, %c0_29] : memref<40x64xbf16, #tpu.memory_space<vmem>>, vector<40x64xbf16>
    %cst_30 = arith.constant dense<0.000000e+00> : vector<1x64xf32>
    %48 = tpu.matmul %39, %47, %cst_30 {dimension_numbers = #tpu.dot_dimension_numbers<[1], [0], [0], [1], [0, 0, 1, 1], [], []>} : vector<1x40xbf16>, vector<40x64xbf16>, vector<1x64xf32> -> vector<1x64xf32>
    %c0_31 = arith.constant 0 : index
    %c0_32 = arith.constant 0 : index
    %49 = vector.load %arg12[%c0_31, %c0_32] : memref<1x64xf32, #tpu.memory_space<vmem>>, vector<1x64xf32>
    %50 = arith.addf %48, %49 : vector<1x64xf32>
    %51 = vector.broadcast %50 : vector<1x64xf32> to vector<8x64xf32>
    %52 = arith.addf %46, %51 : vector<8x64xf32>
    %53 = arith.truncf %52 : vector<8x64xf32> to vector<8x64xbf16>
    %c0_33 = arith.constant 0 : index
    %c0_34 = arith.constant 0 : index
    %54 = vector.load %arg13[%c0_33, %c0_34] : memref<64x64xbf16, #tpu.memory_space<vmem>>, vector<64x64xbf16>
    %cst_35 = arith.constant dense<0.000000e+00> : vector<8x64xf32>
    %55 = tpu.matmul %53, %54, %cst_35 {dimension_numbers = #tpu.dot_dimension_numbers<[1], [0], [0], [1], [0, 0, 1, 1], [], []>} : vector<8x64xbf16>, vector<64x64xbf16>, vector<8x64xf32> -> vector<8x64xf32>
    %c0_36 = arith.constant 0 : index
    %c0_37 = arith.constant 0 : index
    %56 = vector.load %arg14[%c0_36, %c0_37] : memref<1x64xf32, #tpu.memory_space<vmem>>, vector<1x64xf32>
    %57 = vector.broadcast %56 : vector<1x64xf32> to vector<8x64xf32>
    %58 = arith.addf %55, %57 : vector<8x64xf32>
    %c0_38 = arith.constant 0 : index
    %c0_39 = arith.constant 0 : index
    %59 = vector.load %arg15[%c0_38, %c0_39] : memref<40x64xbf16, #tpu.memory_space<vmem>>, vector<40x64xbf16>
    %cst_40 = arith.constant dense<0.000000e+00> : vector<1x64xf32>
    %60 = tpu.matmul %39, %59, %cst_40 {dimension_numbers = #tpu.dot_dimension_numbers<[1], [0], [0], [1], [0, 0, 1, 1], [], []>} : vector<1x40xbf16>, vector<40x64xbf16>, vector<1x64xf32> -> vector<1x64xf32>
    %c0_41 = arith.constant 0 : index
    %c0_42 = arith.constant 0 : index
    %61 = vector.load %arg16[%c0_41, %c0_42] : memref<1x64xf32, #tpu.memory_space<vmem>>, vector<1x64xf32>
    %62 = arith.addf %60, %61 : vector<1x64xf32>
    %63 = vector.broadcast %62 : vector<1x64xf32> to vector<8x64xf32>
    %64 = arith.addf %58, %63 : vector<8x64xf32>
    %65 = arith.truncf %64 : vector<8x64xf32> to vector<8x64xbf16>
    %c0_43 = arith.constant 0 : index
    %c0_44 = arith.constant 0 : index
    %66 = vector.load %arg17[%c0_43, %c0_44] : memref<64x16xbf16, #tpu.memory_space<vmem>>, vector<64x16xbf16>
    %cst_45 = arith.constant dense<0.000000e+00> : vector<8x16xf32>
    %67 = tpu.matmul %65, %66, %cst_45 {dimension_numbers = #tpu.dot_dimension_numbers<[1], [0], [0], [1], [0, 0, 1, 1], [], []>} : vector<8x64xbf16>, vector<64x16xbf16>, vector<8x16xf32> -> vector<8x16xf32>
    %c0_46 = arith.constant 0 : index
    %c0_47 = arith.constant 0 : index
    %68 = vector.load %arg18[%c0_46, %c0_47] : memref<1x16xf32, #tpu.memory_space<vmem>>, vector<1x16xf32>
    %69 = vector.broadcast %68 : vector<1x16xf32> to vector<8x16xf32>
    %70 = arith.addf %67, %69 : vector<8x16xf32>
    %c0_48 = arith.constant 0 : index
    %c0_49 = arith.constant 0 : index
    %c0_50 = arith.constant 0 : index
    %71 = vector.load %arg19[%c0_48, %c0_49, %c0_50] : memref<1x8x16xf32, #tpu.memory_space<vmem>>, vector<1x8x16xf32>
    %72 = vector.shape_cast %71 : vector<1x8x16xf32> to vector<8x16xf32>
    %73 = vector.shape_cast %70 : vector<8x16xf32> to vector<1x8x16xf32>
    tpu.vector_store %arg19[%c0_48, %c0_49, %c0_50], %73 {strides = array<i32>} : memref<1x8x16xf32, #tpu.memory_space<vmem>>, vector<1x8x16xf32>,
    return
  }
  func.func @transform_0(%arg0: i32) -> (i32, i32, i32) {
    %c0_i32 = arith.constant 0 : i32
    %c0_i32_0 = arith.constant 0 : i32
    %c0_i32_1 = arith.constant 0 : i32
    return %arg0, %c0_i32, %c0_i32_0 : i32, i32, i32
  }
  func.func @transform_1(%arg0: i32) -> (i32, i32) {
    %c0_i32 = arith.constant 0 : i32
    %c0_i32_0 = arith.constant 0 : i32
    %c0_i32_1 = arith.constant 0 : i32
    return %c0_i32, %c0_i32_0 : i32, i32
  }
  func.func @transform_2(%arg0: i32) -> (i32, i32) {
    %c0_i32 = arith.constant 0 : i32
    %c0_i32_0 = arith.constant 0 : i32
    %c0_i32_1 = arith.constant 0 : i32
    return %c0_i32, %c0_i32_0 : i32, i32
  }
  func.func @transform_3(%arg0: i32) -> (i32, i32) {
    %c0_i32 = arith.constant 0 : i32
    %c0_i32_0 = arith.constant 0 : i32
    %c0_i32_1 = arith.constant 0 : i32
    return %c0_i32, %c0_i32_0 : i32, i32
  }
  func.func @transform_4(%arg0: i32) -> (i32, i32) {
    %c0_i32 = arith.constant 0 : i32
    %c0_i32_0 = arith.constant 0 : i32
    %c0_i32_1 = arith.constant 0 : i32
    return %c0_i32, %c0_i32_0 : i32, i32
  }
  func.func @transform_5(%arg0: i32) -> (i32, i32) {
    %c0_i32 = arith.constant 0 : i32
    %c0_i32_0 = arith.constant 0 : i32
    %c0_i32_1 = arith.constant 0 : i32
    return %c0_i32, %c0_i32_0 : i32, i32
  }
  func.func @transform_6(%arg0: i32) -> (i32, i32, i32) {
    %c0_i32 = arith.constant 0 : i32
    %c0_i32_0 = arith.constant 0 : i32
    %c0_i32_1 = arith.constant 0 : i32
    return %arg0, %c0_i32, %c0_i32_0 : i32, i32, i32
  }
  func.func @transform_7(%arg0: i32) -> (i32, i32, i32) {
    %c0_i32 = arith.constant 0 : i32
    %c0_i32_0 = arith.constant 0 : i32
    %c0_i32_1 = arith.constant 0 : i32
    return %arg0, %c0_i32, %c0_i32_0 : i32, i32, i32
  }
  func.func @transform_8(%arg0: i32) -> (i32, i32) {
    %c0_i32 = arith.constant 0 : i32
    %c0_i32_0 = arith.constant 0 : i32
    %c0_i32_1 = arith.constant 0 : i32
    return %c0_i32, %c0_i32_0 : i32, i32
  }
  func.func @transform_9(%arg0: i32) -> (i32, i32) {
    %c0_i32 = arith.constant 0 : i32
    %c0_i32_0 = arith.constant 0 : i32
    %c0_i32_1 = arith.constant 0 : i32
    return %c0_i32, %c0_i32_0 : i32, i32
  }
  func.func @transform_10(%arg0: i32) -> (i32, i32) {
    %c0_i32 = arith.constant 0 : i32
    %c0_i32_0 = arith.constant 0 : i32
    %c0_i32_1 = arith.constant 0 : i32
    return %c0_i32, %c0_i32_0 : i32, i32
  }
  func.func @transform_11(%arg0: i32) -> (i32, i32) {
    %c0_i32 = arith.constant 0 : i32
    %c0_i32_0 = arith.constant 0 : i32
    %c0_i32_1 = arith.constant 0 : i32
    return %c0_i32, %c0_i32_0 : i32, i32
  }
  func.func @transform_12(%arg0: i32) -> (i32, i32) {
    %c0_i32 = arith.constant 0 : i32
    %c0_i32_0 = arith.constant 0 : i32
    %c0_i32_1 = arith.constant 0 : i32
    return %c0_i32, %c0_i32_0 : i32, i32
  }
  func.func @transform_13(%arg0: i32) -> (i32, i32) {
    %c0_i32 = arith.constant 0 : i32
    %c0_i32_0 = arith.constant 0 : i32
    %c0_i32_1 = arith.constant 0 : i32
    return %c0_i32, %c0_i32_0 : i32, i32
  }
  func.func @transform_14(%arg0: i32) -> (i32, i32) {
    %c0_i32 = arith.constant 0 : i32
    %c0_i32_0 = arith.constant 0 : i32
    %c0_i32_1 = arith.constant 0 : i32
    return %c0_i32, %c0_i32_0 : i32, i32
  }
  func.func @transform_15(%arg0: i32) -> (i32, i32) {
    %c0_i32 = arith.constant 0 : i32
    %c0_i32_0 = arith.constant 0 : i32
    %c0_i32_1 = arith.constant 0 : i32
    return %c0_i32, %c0_i32_0 : i32, i32
  }
  func.func @transform_16(%arg0: i32) -> (i32, i32) {
    %c0_i32 = arith.constant 0 : i32
    %c0_i32_0 = arith.constant 0 : i32
    %c0_i32_1 = arith.constant 0 : i32
    return %c0_i32, %c0_i32_0 : i32, i32
  }
  func.func @transform_17(%arg0: i32) -> (i32, i32) {
    %c0_i32 = arith.constant 0 : i32
    %c0_i32_0 = arith.constant 0 : i32
    %c0_i32_1 = arith.constant 0 : i32
    return %c0_i32, %c0_i32_0 : i32, i32
  }
  func.func @transform_18(%arg0: i32) -> (i32, i32, i32) {
    %c0_i32 = arith.constant 0 : i32
    %c0_i32_0 = arith.constant 0 : i32
    %c0_i32_1 = arith.constant 0 : i32
    return %arg0, %c0_i32, %c0_i32_0 : i32, i32, i32
  }
}

</mosaic_0001>

<bundles_post_ra>
// kernel: tpu_custom_call.1
= control target key start
LH: loop header
LB: loop body
LE: loop exit
PB: predicated region body
PF: predicated region fallthrough
CT: control target
= control target key end

     0   :  { %s2214_s0 = inlined_call_operand.vmem [shape: f32[2,1,1], index: 0, kind: input, shape index: {}]   ;;  %s2215_s1 = inlined_call_operand.vmem [shape: f32[1,16], index: 1, kind: input, shape index: {}]   ;;  %s2216_s2 = inlined_call_operand.vmem [shape: bf16[32,128], index: 2, kind: input, shape index: {}]   ;;  %s2217_s3 = inlined_call_operand.vmem [shape: f32[1,128], index: 3, kind: input, shape index: {}]   ;;  %s2218_s4 = inlined_call_operand.vmem [shape: bf16[128,32], index: 4, kind: input, shape index: {}]   ;;  %s2219_s5 = inlined_call_operand.vmem [shape: f32[1,32], index: 5, kind: input, shape index: {}]   ;;  %s2220_s6 = inlined_call_operand.vmem [shape: f32[2,1,8], index: 6, kind: input, shape index: {}]   ;;  %s2221_s7 = inlined_call_operand.vmem [shape: bf16[2,8,16], index: 7, kind: input, shape index: {}]   ;;  %s2222_s8 = inlined_call_operand.vmem [shape: bf16[16,64], index: 8, kind: input, shape index: {}]   ;;  %s2223_s9 = inlined_call_operand.vmem [shape: f32[1,64], index: 9, kind: input, shape index: {}]   ;;  %s2224_s10 = inlined_call_operand.vmem [shape: bf16[40,64], index: 10, kind: input, shape index: {}]   ;;  %s2225_s11 = inlined_call_operand.vmem [shape: f32[1,64], index: 11, kind: input, shape index: {}]   ;;  %s2226_s12 = inlined_call_operand.vmem [shape: bf16[64,64], index: 12, kind: input, shape index: {}]   ;;  %s2227_s13 = inlined_call_operand.vmem [shape: f32[1,64], index: 13, kind: input, shape index: {}]   ;;  %s2228_s14 = inlined_call_operand.vmem [shape: bf16[40,64], index: 14, kind: input, shape index: {}]   ;;  %s2229_s15 = inlined_call_operand.vmem [shape: f32[1,64], index: 15, kind: input, shape index: {}]   ;;  %s2230_s16 = inlined_call_operand.vmem [shape: bf16[64,16], index: 16, kind: input, shape index: {}]   ;;  %s2231_s17 = inlined_call_operand.vmem [shape: f32[1,16], index: 17, kind: input, shape index: {}]   ;;  %s2232_s18 = inlined_call_operand.hbm [shape: f32[2,8,16], index: 18, kind: output, shape index: {}]  }
   0x1   :  { %2238 = sst [smem:[#allocation8_spill]] %s2214_s0 }
   0x2   :  { %2239 = sst [smem:[#allocation9_spill]] %s2215_s1 }
   0x3   :  { %2240 = sst [smem:[#allocation10_spill]] %s2216_s2 }
   0x4   :  { %2241 = sst [smem:[#allocation11_spill]] %s2217_s3 }
   0x5   :  { %2242 = sst [smem:[#allocation12_spill]] %s2218_s4 }
   0x6   :  { %23 = vsyncpa [#allocation3], 0 }
   0x7   :  { %25 = vsyncpa [#allocation3 + $0x1], 0  ;;  %s1931_s27 = smov 0   ;;  %s1933_s28 = smov 0  }
   0x8   :  { %s1935_s29 = smov 0   ;;  %s1937_s30 = smov 0  }
   0x9 LB: > { %2243 = sst [smem:[#allocation5_spill]] %s1818_s29  ;;  %s1952_s0 = sadd.s32 4294967295, %s1822_s30   ;;  %s1822_s30 = sphi %s1937_s30, %s2254_s30   ;;  %s1818_s29 = sphi %s1935_s29, %s2256_s29   ;;  %s1814_s28 = sphi %s1933_s28, %s2258_s28   ;;  %s1810_s27 = sphi %s1931_s27, %s2257_s27  }
   0xa   : > { %s1501_s19 = sadd.s32 4294967294, %s1822_s30   ;;  %s1956_s1 = sadd.s32 1, %s1822_s30  }
   0xb   : > { %2244 = sst [smem:[#allocation6_spill]] %s1956_s1  ;;  %s431_s20 = sadd.s32 1, %s1818_s29 }
   0xc   : > { %s428_s21 = ssub.s32 %s1822_s30, %s1956_s1  ;;  %p441_p0 = scmp.ne.s32.totalorder %s1818_s29, %s1814_s28 }
   0xd   : > { %p429_p1 = scmp.eq.s32.totalorder %s428_s21, 0  ;;  %p442_p2 = scmp.eq.s32.totalorder %s1952_s0, 1 }
   0xe   : > { %p447_p3 = scmp.ne.s32.totalorder %s1814_s28, %s1810_s27  ;;  %p448_p4 = scmp.eq.s32.totalorder %s1501_s19, 1 }
   0xf   : > { %s1967_s22 = scalar_select %p429_p1, %s1818_s29, %s431_s20  }
  0x10   : > { %p1969_p5 = por %p442_p2, %p441_p0  ;;  %p1973_p6 = por %p448_p4, %p447_p3 }
  0x11   : > { %2245 = sst [smem:[#allocation7_spill]] %s1967_s22  ;;  %p1504_p7 = scmp.ge.s32.totalorder %s1822_s30, 1 }
  0x12   : > { %p530_p8 = scmp.lt.s32.totalorder %s1822_s30, 3 }
  0x14   : > { %p531_p9 = pnand %p1504_p7, %p530_p8 }
  0x15   : > { %p589_p10 = scmp.lt.s32.totalorder (!%p531_p9), %s1952_s0, 1  ;;  %v1824_v0 = vmov (!%p531_p9), 0   ;;  %s2248_s19 = sld [smem:[#allocation8_spill]] (!%p531_p9)  ;;  %v1825_v3 = vmov (!%p531_p9), 0.0   ;;  %v607_v4 = vlaneseq (!%p531_p9)  ;;  %v1826_v21 = vmov (!%p531_p9), 683565275  }
  0x16   : > { %534 = sbr.rel (%p531_p9) target bundleno = 1553 (0x611), region = 92  ;;  %1718 = vset.pattern.permute.xlu0 (!%p531_p9), %v1824_v0  ;;  %s2249_s29 = sld [smem:[#allocation10_spill]] (!%p531_p9)  ;;  %1586 = vmatprep.subr.bf16.mxu1 (!%p531_p9), %v1825_v3  ;;  %v1827_v23 = vmov (!%p531_p9), 2475754826   ;;  %v1828_v26 = vmov (!%p531_p9), 2131351028  }
  0x17   : > { %1614 = vmatprep.subr.bf16.mxu0 (!%p531_p9), %v1825_v3  ;;  %v608_v5 = vshrl.u32 (!%p531_p9), %v607_v4, 7  ;;  %v1829_v29 = vmov (!%p531_p9), 2102212464   ;;  %v1830_v32 = vmov (!%p531_p9), 920167782   ;;  %vm1832_vm9 = vmmov (!%p531_p9), 0  }
  0x18   : > { %v1831_v35 = vmov (!%p531_p9), 1326507024   ;;  %1590 = vmatprep.mubr.msk.bf16.mxu1 (!%p531_p9), %vm1832_vm9, %v1825_v3  ;;  %1616 = vmatprep.mubr.msk.bf16.mxu0 (!%p531_p9), %vm1832_vm9, %v1825_v3  ;;  %s2252_s4 = sld [smem:[#allocation12_spill]] (!%p531_p9)  ;;  %s2253_s3 = sld [smem:[#allocation11_spill]] (!%p531_p9) }
  0x19   : > { %v1993_v6 = vsub.s32 (!%p531_p9), 0, %v608_v5 }
  0x1c   : > { %s2250_s1 = smov (!%p531_p9), %s2249_s29  ;;  %v1719_v2 = vld [vmem:[%s2249_s29] sm:$0xff] (!%p531_p9)  }
  0x1d   : > { %s1981_s24 = scalar_select %p589_p10, %s1952_s0, 1  ;;  %1587 = vmatpush3.bf16.msra.mxu1 %v1719_v2 }
  0x1e   : > { %1588 = vmatprep.subr.bf16.mxu1 %v1825_v3 }
  0x1f   : > { %s591_s20 = scalar_lea.vmem %s2248_s19, %s1981_s24  ;;  %s2251_s19 = sld [smem:[#allocation9_spill]] }
  0x20   : > { %v600_v1 = vld [vmem:[%s591_s20] sm:$0x1]  ;;  %s1833_s20 = smov 16   ;;  %s594_s26 = scalar_lea.vmem %s2220_s6, %s1981_s24 }
  0x21   : > { %604 = vperm.xlu0 %1718, %v600_v1  }
  0x25   : > { %v601_v7 = vld [vmem:[%s2251_s19] sm:$0x1]  ;;  %s1834_s19 = smov 32  }
  0xa0   : > { %v605_v8 = vpop.permute.xlu0 %604 }
  0xa1   : > { %v610_v9 = vrot.slane %v605_v8, %v1993_v6 }
  0xa3   : > { %v1999_v10 = vmul.f32 %v610_v9, %v601_v7 }
  0xa5   : > { %v615_v11 = vand.u32 2139095040, %v1999_v10  ;;  %v612_v15 = vand.u32 2147483647, %v1999_v10  ;;  %vm614_vm7 = vcmp.lt.s32.totalorder %v1999_v10, 0 }
  0xa7   : > { %v616_v12 = vshrl.u32 %v615_v11, 23  ;;  %v619_v18 = vand.u32 8388607, %v612_v15  ;;  %vm613_vm8 = vcmp.le.f32.partialorder %v612_v15, 0.7853982 }
  0xa9   : > { %v1507_v13 = vadd.s32 4294967169, %v616_v12  ;;  %v620_v37 = vor.u32 8388608, %v619_v18 }
  0xab   : > { %v622_v14 = vadd.s32 1, %v1507_v13  ;;  %v660_v51 = vshll.u32 %v620_v37, 8 }
  0xad   : > { %vm623_vm0 = vcmp.gt.s32.totalorder %v622_v14, 0 }
  0xae   : > { %v624_v16 = vsel %vm623_vm0, %v622_v14, 0  ;;  %vm704_vm0 = vweird.f32 %v1999_v10 }
  0xaf   : > { %v626_v17 = vand.u32 31, %v624_v16  ;;  %v625_v20 = vshrl.u32 %v624_v16, 5 }
  0xb1   : > { %v627_v19 = vsub.s32 32, %v626_v17  ;;  %v629_v22 = vshll.u32 %v1826_v21, %v626_v17  ;;  %v632_v24 = vshll.u32 %v1827_v23, %v626_v17  ;;  %v635_v28 = vshll.u32 %v1828_v26, %v626_v17 }
  0xb2   : > { %v638_v31 = vshll.u32 %v1829_v29, %v626_v17  ;;  %v641_v34 = vshll.u32 %v1830_v32, %v626_v17  ;;  %vm644_vm1 = vcmp.lt.s32.totalorder %v625_v20, 1  ;;  %vm647_vm2 = vcmp.lt.s32.totalorder %v625_v20, 4 }
  0xb3   : > { %v630_v25 = vshrl.u32 %v1827_v23, %v627_v19  ;;  %v633_v27 = vshrl.u32 %v1828_v26, %v627_v19  ;;  %v636_v30 = vshrl.u32 %v1829_v29, %v627_v19  ;;  %v639_v33 = vshrl.u32 %v1830_v32, %v627_v19 }
  0xb4   : > { %v642_v36 = vshrl.u32 %v1831_v35, %v627_v19  ;;  %v628_v46 = vshrl.u32 %v1826_v21, %v627_v19  ;;  %vm646_vm3 = vcmp.lt.s32.totalorder %v625_v20, 3  ;;  %vm645_vm4 = vcmp.lt.s32.totalorder %v625_v20, 2 }
  0xb5   : > { %v631_v38 = vor.u32 %v630_v25, %v629_v22  ;;  %v634_v39 = vor.u32 %v633_v27, %v632_v24  ;;  %v637_v40 = vor.u32 %v636_v30, %v635_v28  ;;  %v640_v41 = vor.u32 %v639_v33, %v638_v31  ;;  %v1720_v33 = vld [vmem:[%s2250_s1 + $0x8] sm:$0xff]   ;;  %s1506_s1 = sshll.u32 %s1981_s24, 2 }
  0xb6   : > { %v643_v42 = vor.u32 %v642_v36, %v641_v34  ;;  %1589 = vmatpush3.bf16.msra.mxu1 %v1720_v33 }
  0xb7   : > { %v649_v43 = vsel %vm647_vm2, %v637_v40, 2102212464  ;;  %v652_v44 = vsel %vm644_vm1, %v631_v38, %v634_v39  ;;  %v656_v45 = vsel %vm644_vm1, %v634_v39, %v637_v40  ;;  %v653_v47 = vsel %vm647_vm2, %v640_v41, 920167782  ;;  %1594 = vmatprep.subr.bf16.mxu1 %v1825_v3 }
  0xb8   : > { %v657_v48 = vsel %vm647_vm2, %v643_v42, 1326507024  ;;  %v654_v49 = vsel %vm646_vm3, %v637_v40, %v653_v47  ;;  %v648_v52 = vsel %vm644_vm1, %v628_v46, %v631_v38  ;;  %v650_v53 = vsel %vm646_vm3, %v634_v39, %v649_v43 }
  0xb9   : > { %v658_v50 = vsel %vm646_vm3, %v640_v41, %v657_v48  ;;  %v655_v54 = vsel %vm645_vm4, %v652_v44, %v654_v49  ;;  %v651_v60 = vsel %vm645_vm4, %v648_v52, %v650_v53  ;;  %vm827_vm1 = vcmask 130048   ;;  %v1723_v52 = vld [vmem:[%s2252_s4 + $0x10] sm:$0xff]   ;;  %v1724_v53 = vld [vmem:[%s2252_s4 + $0x18] sm:$0xff]  }
  0xba   : > { %v659_v55 = vsel %vm645_vm4, %v656_v45, %v658_v50  ;;  %v2008_v58 = vmul.u32.u64.low %v660_v51, %v655_v54  ;;  %v2009_v59 = vmul.u32.u64.high %v660_v51, %v655_v54, %v2008_v58  ;;  %v667_v62 = vmul.u32 %v660_v51, %v651_v60  ;;  %v1725_v54 = vld [vmem:[%s2252_s4 + $0x20] sm:$0xff]  }
  0xbb   : > { %v2005_v56 = vmul.u32.u64.low %v660_v51, %v659_v55  ;;  %v2006_v57 = vmul.u32.u64.high %v660_v51, %v659_v55, %v2005_v56  ;;  %vm847_vm2 = vcmask 261120   ;;  %v1722_v51 = vld [vmem:[%s2252_s4 + $0x8] sm:$0xff]  }
  0xbc   : > { %v670_v61 = vadd.s32 1, %v2009_v59  ;;  %v1726_v55 = vld [vmem:[%s2252_s4 + $0x28] sm:$0xff]   ;;  %v1727_v56 = vld [vmem:[%s2252_s4 + $0x30] sm:$0xff]  }
  0xbd   : > { %vm669_vm5 = vc.u32 %v2006_v57, %v2008_v58  ;;  %v668_v13 = vadd.s32 %v2008_v58, %v2006_v57  ;;  %v1728_v57 = vld [vmem:[%s2252_s4 + $0x38] sm:$0xff]   ;;  %v1526_v58 = vld [vmem:[%s594_s26] ss:$0 sm:$0xff] }
  0xbe   : > { %v671_v63 = vsel %vm669_vm5, %v670_v61, %v2009_v59  ;;  %1019 = vrot.lane.b32.xlu1 %v1526_v58, %s1834_s19  ;;  %v834_v59 = vld [vmem:[%s2253_s3] sm:$0x1]  ;;  %s598_s19 = scalar_lea.vmem %s2221_s7, %s1506_s1  ;;  %vm1124_vm5 = vcmask 1043456   ;;  %v1739_v58 = vld [vmem:[%s2226_s12 + $0x18] sm:$0xff]  }
  0xbf   : > { %v672_v0 = vadd.s32 %v671_v63, %v667_v62 }
  0xc1   : > { %v673_v1 = vadd.s32 536870912, %v672_v0 }
  0xc3   : > { %v674_v2 = vshrl.u32 %v673_v1, 30 }
  0xc5   : > { %v675_v4 = vshll.u32 %v674_v2, 30  ;;  %v698_v26 = vsub.s32 4, %v674_v2 }
  0xc7   : > { %v676_v5 = vsub.s32 %v672_v0, %v675_v4  ;;  %v699_v29 = vsel %vm614_vm7, %v698_v26, %v674_v2  ;;  %v1734_v26 = vld [vmem:[%s2224_s10 + $0x10] ss:$0 sps:$4 sm:$0xff]  }
  0xc8   : > { %v701_v31 = vsel %vm613_vm8, 0, %v699_v29 }
  0xc9   : > { %v678_v7 = vsub.s32 0, %v676_v5  ;;  %v705_v32 = vadd.s32 3, %v701_v31  ;;  %v809_v34 = vand.u32 3, %v701_v31 }
  0xcb   : > { %v1508_v8 = vmin.u32 %v678_v7, %v676_v5  ;;  %v706_v35 = vand.u32 3, %v705_v32  ;;  %vm814_vm10 = vcmp.eq.s32.totalorder %v809_v34, 2  ;;  %vm811_vm12 = vcmp.eq.s32.totalorder %v809_v34, 0 }
  0xcc   : > { %vm810_vm14 = vcmp.lt.s32.totalorder %v809_v34, 2 }
  0xcd   : > { %v680_v9 = vclz %v1508_v8  ;;  %vm711_vm11 = vcmp.eq.s32.totalorder %v706_v35, 2  ;;  %vm708_vm13 = vcmp.eq.s32.totalorder %v706_v35, 0  ;;  %vm707_vm15 = vcmp.lt.s32.totalorder %v706_v35, 2 }
  0xcf   : > { %v1509_v11 = vadd.s32 4294967294, %v680_v9 }
  0xd1   : > { %vm1510_vm6 = vcmp.lt.s32.totalorder %v1509_v11, 0 }
  0xd2   : > { %v683_v12 = vsel %vm1510_vm6, 0, %v1509_v11 }
  0xd3   : > { %v684_v14 = vsub.s32 32, %v683_v12  ;;  %v688_v16 = vsub.s32 4294967266, %v683_v12  ;;  %v685_v17 = vshll.u32 %v676_v5, %v683_v12 }
  0xd5   : > { %v686_v18 = vshrl.u32 %v668_v13, %v684_v14  ;;  %v689_v19 = vadd.s32 127, %v688_v16 }
  0xd7   : > { %v687_v20 = vor.u32 %v686_v18, %v685_v17  ;;  %v690_v21 = vshll.u32 %v689_v19, 23 }
  0xd9   : > { %v691_v22 = vor.u32 4788187, %v690_v21  ;;  %v694_v24 = vcvt.s32.f32 %v687_v20  ;;  %v1729_v20 = vld [vmem:[%s2222_s8] sm:$0xff]  }
  0xda   : > { %1615 = vmatpush3.bf16.msra.mxu0 %v1729_v20  ;;  %v1040_v21 = vld [vmem:[%s598_s19] sm:$0xf] }
  0xdb   : > { %v692_v23 = vand.u32 2147483647, %v691_v22  ;;  %1620 = vmatprep.subr.bf16.mxu0 %v1825_v3  ;;  %v1730_v22 = vld [vmem:[%s2224_s10] sm:$0xff]  }
  0xdc   : > { %v1534_v20 = vld [vmem:[%s2227_s13] ss:$0 sm:$0xff] }
  0xdd   : > { %v695_v25 = vmul.f32 %v694_v24, %v692_v23  ;;  %1617 = vmatmul.mubr.msk.bf16.vlgmr.msra.gmra.mrb[0].mxu0 %vm827_vm1, %v1040_v21  ;;  %v1731_v23 = vld [vmem:[%s2228_s14] sm:$0xff]   ;;  %v1732_v24 = vld [vmem:[%s2224_s10 + $0x8] sm:$0xff]  }
  0xde   : > { %1626 = vmatprep.mubr.msk.bf16.mxu0 %vm1832_vm9, %v1825_v3  ;;  %1621 = vmatpush3.bf16.msra.mxu0 %v1730_v22 }
  0xdf   : > { %v696_v27 = vxor.u32 2147483648, %v695_v25  ;;  %1622 = vmatprep.subr.bf16.mxu0 %v1825_v3 }
  0xe1   : > { %v697_v28 = vsel %vm614_vm7, %v696_v27, %v695_v25  ;;  %v1733_v25 = vld [vmem:[%s2228_s14 + $0x8] sm:$0xff]   ;;  %v1735_v27 = vld [vmem:[%s2228_s14 + $0x10] ss:$0 sps:$4 sm:$0xff]  }
  0xe2   : > { %v700_v30 = vsel %vm613_vm8, %v1999_v10, %v697_v28  ;;  %v1721_v10 = vld [vmem:[%s2252_s4] sm:$0xff]   ;;  %1623 = vmatpush3.bf16.msra.mxu0 %v1732_v24  ;;  %v1126_v28 = vsel %vm1124_vm5, %v1734_v26, 0  ;;  %v1279_v29 = vsel %vm1124_vm5, %v1735_v27, 0  ;;  %vm1120_vm8 = vcmask 326656   ;;  %s1551_s4 = sshll.u32 %s1952_s0, 7 }
  0xe3   : > { %1744 = vcosq.f32 %v700_v30  ;;  %1624 = vmatprep.subr.bf16.mxu0 %v1825_v3  ;;  %s2171_s22 = scalar_lea.hbm %s2232_s18, %s1551_s4 }
  0xe4   : > { %1746 = vsinq.f32 %v700_v30  ;;  %v924_v30 = vld [vmem:[%s2219_s5] sm:$0x1] }
  0xe6   : > { %1625 = vmatpush3.bf16.msra.mxu0 %v1126_v28  ;;  %v1544_v28 = vld [vmem:[%s2231_s17] ss:$0 sm:$0xff] }
  0xe7   : > { %1630 = vmatprep.subr.bf16.mxu0 %v1825_v3 }
  0xed   : > { %v1745_v15 = vpop.eup %1744 }
  0xee   : > { %v1747_v36 = vpop.eup %1746  ;;  %v712_v37 = vxor.u32 2147483648, %v1745_v15 }
  0xef   : > { %v709_v38 = vxor.u32 2147483648, %v1747_v36 }
  0xf0   : > { %v816_v39 = vsel %vm814_vm10, %v712_v37, %v1747_v36  ;;  %v713_v40 = vsel %vm711_vm11, %v712_v37, %v1747_v36  ;;  %vm1213_vm10 = vcmask 523264  }
  0xf1   : > { %v813_v41 = vsel %vm811_vm12, %v1745_v15, %v709_v38  ;;  %v710_v42 = vsel %vm708_vm13, %v1745_v15, %v709_v38 }
  0xf2   : > { %v817_v43 = vsel %vm810_vm14, %v813_v41, %v816_v39  ;;  %v714_v44 = vsel %vm707_vm15, %v710_v42, %v713_v40 }
  0xf3   : > { %v818_v45 = vsel %vm704_vm0, nan, %v817_v43  ;;  %v715_v46 = vsel %vm704_vm0, nan, %v714_v44 }
  0xf4   : > { %v823_v47 = vrot.slane %v818_v45, %v1993_v6 }
  0xf6   : > { %824 = vrot.lane.b32.xlu0 %v823_v47, %s1833_s20  ;;  %s586_s20 = sand.u32 1, %s1814_s28  }
  0xf7   : > { %s1505_s21 = sshll.u32 %s586_s20, 3  ;;  %s1411_s0 = scalar_lea.sflag [#allocation3], %s586_s20 }
  0xf8   : > { %s588_s25 = scalar_lea.vmem [#allocation2], %s1505_s21  ;;  %s1835_s21 = smov [#allocation2]  }
  0xf9   : > { %s1424_s26 = sshll.u32 %s588_s25, 4  ;;  %s1764_s1 = sshll.u32 %s1835_s21, 4  ;;  %s2173_s26 = int_to_ptr.vmem [resolvable:$true] %s1424_s26  ;;  %s1765_s1 = int_to_ptr.vmem [resolvable:$false] %s1764_s1 }
  0xfa   : > { %s1760_s24 = scalar_lea.vmem %s2173_s26, 128  ;;  %s1766_s3 = scalar_lea.vmem %s1765_s1, 256 }
  0xfb   : > { %p1761_p11 = scmp.ne.s32.totalorder %s2173_s26, %s1760_s24  ;;  %p1767_p0 = scmp.lt.s32.totalorder %s2173_s26, %s1765_s1 }
  0xfc   : > { %p1768_p1 = scmp.lt.s32.totalorder %s1766_s3, %s1760_s24 }
  0xfd   : > { %p1762_p12 = pnand %p1761_p11, %p1969_p5 }
  0xfe   : > { %p1769_p2 = por %p1768_p1, %p1767_p0 }
  0xff   : > { %p1763_p13 = pneg %p1762_p12 }
 0x101   : > { %p1770_p3 = pnand %p1769_p2, %p1763_p13 }
 0x130   : > { %v1020_v32 = vpop.permute.xlu1 %1019 }
 0x168   : > { %v825_v48 = vpop.permute.xlu0 %824 }
 0x169   : > { %v828_v49 = vsel %vm827_vm1, %v715_v46, %v825_v48 }
 0x16a   : > { %v829_v50 = vpack.c.bf16 %v828_v49, %v828_v49 }
 0x16c   : > { %1591 = vmatmul.mubr.msk.bf16.vlgmr.msra.gmra.mrb[0].mxu1 %vm847_vm2, %v829_v50 }
 0x16d   : > { %1610 = vmatprep.mubr.msk.bf16.mxu1 %vm1832_vm9, %v1825_v3  ;;  %1595 = vmatpush3.bf16.msra.mxu1 %v1721_v10  ;;  %v1736_v10 = vld [vmem:[%s2226_s12] sm:$0xff]  }
 0x16e   : > { %1596 = vmatprep.subr.bf16.mxu1 %v1825_v3 }
 0x171   : > { %1597 = vmatpush3.bf16.msra.mxu1 %v1722_v51 }
 0x172   : > { %1598 = vmatprep.subr.bf16.mxu1 %v1825_v3 }
 0x175   : > { %1599 = vmatpush3.bf16.msra.mxu1 %v1723_v52  ;;  %v1737_v52 = vld [vmem:[%s2226_s12 + $0x8] sm:$0xff]  }
 0x176   : > { %1600 = vmatprep.subr.bf16.mxu1 %v1825_v3 }
 0x179   : > { %1601 = vmatpush3.bf16.msra.mxu1 %v1724_v53 }
 0x17a   : > { %1602 = vmatprep.subr.bf16.mxu1 %v1825_v3 }
 0x17d   : > { %1603 = vmatpush3.bf16.msra.mxu1 %v1725_v54 }
 0x17e   : > { %1604 = vmatprep.subr.bf16.mxu1 %v1825_v3 }
 0x181   : > { %1605 = vmatpush3.bf16.msra.mxu1 %v1726_v55 }
 0x182   : > { %1606 = vmatprep.subr.bf16.mxu1 %v1825_v3 }
 0x185   : > { %1607 = vmatpush3.bf16.msra.mxu1 %v1727_v56 }
 0x186   : > { %1608 = vmatprep.subr.bf16.mxu1 %v1825_v3 }
 0x189   : > { %1609 = vmatpush3.bf16.msra.mxu1 %v1728_v57  ;;  %v1738_v57 = vld [vmem:[%s2226_s12 + $0x10] sm:$0xff]  }
 0x18a   : > { %1642 = vmatprep.subr.bf16.mxu1 %v1825_v3 }
 0x1b0   : > { %v1093_v53 = vpop.f32.mrb[0].mxu0 }
 0x1b1   : > { %v1618_v54 = vpop.f32.mrb[1].mxu0 }
 0x1b2   : > { %v1096_v55 = vpop.f32.mrb[2].mxu0 }
 0x1b3   : > { %v1619_v56 = vpop.f32.mrb[3].mxu0 }
 0x23f   : > { %v885_v60 = vpop.f32.mrb[0].mxu1 }
 0x240   : > { %v886_v61 = vadd.f32 %v885_v60, %v834_v59  ;;  %v1592_v62 = vpop.f32.mrb[1].mxu1  ;;  %v1104_v59 = vld [vmem:[%s2225_s11] sm:$0x1] }
 0x241   : > { %v888_v63 = vpop.f32.mrb[2].mxu1  ;;  %v1527_v60 = vld [vmem:[%s2223_s9] ss:$0 sm:$0xff] }
 0x242   : > { %v892_v0 = vmin.f32 %v886_v61, 20.0  ;;  %v1593_v1 = vpop.f32.mrb[3].mxu1  ;;  %vm891_vm4 = vcmp.gt.f32.partialorder %v886_v61, 20.0 }
 0x244   : > { %v893_v2 = vmul.f32 1.442695, %v892_v0 }
 0x246   : > { %1748 = vpow2.f32 %v893_v2 }
 0x250   : > { %v1749_v4 = vpop.eup %1748 }
 0x251   : > { %v895_v5 = vadd.f32 1.0, %v1749_v4  ;;  %v898_v7 = vmul.f32 -0.5, %v1749_v4  ;;  %v901_v9 = vand.u32 2147483647, %v1749_v4 }
 0x253   : > { %1750 = vlog2.f32 %v895_v5  ;;  %v899_v8 = vadd.f32 1.0, %v898_v7  ;;  %vm902_vm3 = vcmp.lt.f32.partialorder %v901_v9, 0.0004427343  ;;  %v1094_v5 = vadd.f32 %v1527_v60, %v1093_v53 }
 0x255   : > { %v900_v13 = vmul.f32 %v1749_v4, %v899_v8 }
 0x25d   : > { %v1751_v11 = vpop.eup %1750 }
 0x25e   : > { %v897_v12 = vmul.f32 0.6931472, %v1751_v11 }
 0x260   : > { %v903_v14 = vsel %vm902_vm3, %v900_v13, %v897_v12  ;;  %v1740_v12 = vld [vmem:[%s2230_s16] sm:$0xff]  }
 0x261   : > { %v904_v16 = vsel %vm891_vm4, %v886_v61, %v903_v14  ;;  %v1741_v14 = vld [vmem:[%s2230_s16 + $0x8] sm:$0xff]  }
 0x262   : > { %1752 = vtanh.f32 %v904_v16  ;;  %v1742_v16 = vld [vmem:[%s2230_s16 + $0x10] sm:$0xff]  }
 0x26c   : > { %v1753_v17 = vpop.eup %1752 }
 0x26d   : > { %v906_v18 = vmul.f32 %v1753_v17, %v886_v61  ;;  %v1743_v17 = vld [vmem:[%s2230_s16 + $0x18] sm:$0xff]  }
 0x26f   : > { %v907_v19 = vpack.c.bf16 %v906_v18, %v906_v18  ;;  %v1262_v18 = vld [vmem:[%s2229_s15] sm:$0x1] }
 0x271   : > { %1611 = vmatmul.mubr.bf16.vlgmr.msra.gmra.mrb[4].mxu1 %v907_v19 }
 0x272   : > { %1648 = vmatprep.mubr.msk.bf16.mxu1 %vm1832_vm9, %v1825_v3  ;;  %1643 = vmatpush3.bf16.msra.mxu1 %v1731_v23 }
 0x273   : > { %1644 = vmatprep.subr.bf16.mxu1 %v1825_v3 }
 0x276   : > { %1645 = vmatpush3.bf16.msra.mxu1 %v1733_v25 }
 0x277   : > { %1646 = vmatprep.subr.bf16.mxu1 %v1825_v3 }
 0x27a   : > { %1647 = vmatpush3.bf16.msra.mxu1 %v1279_v29 }
 0x344   : > { %v1007_v31 = vpop.f32.mrb[4].mxu1 }
 0x345   : > { %v1008_v33 = vadd.f32 %v1007_v31, %v924_v30  ;;  %v1612_v34 = vpop.f32.mrb[5].mxu1 }
 0x346   : > { %v1010_v35 = vpop.f32.mrb[6].mxu1 }
 0x347   : > { %v1022_v15 = vsel %vm847_vm2, %v1008_v33, %v1020_v32  ;;  %v1613_v36 = vpop.f32.mrb[7].mxu1 }
 0x348   : > { %v1024_v37 = vmin.f32 %v1022_v15, 20.0  ;;  %vm1023_vm7 = vcmp.gt.f32.partialorder %v1022_v15, 20.0 }
 0x34a   : > { %v1025_v38 = vmul.f32 1.442695, %v1024_v37 }
 0x34c   : > { %1754 = vpow2.f32 %v1025_v38 }
 0x356   : > { %v1755_v39 = vpop.eup %1754 }
 0x357   : > { %v1027_v40 = vadd.f32 1.0, %v1755_v39  ;;  %v1030_v41 = vmul.f32 -0.5, %v1755_v39  ;;  %v1033_v43 = vand.u32 2147483647, %v1755_v39 }
 0x359   : > { %1756 = vlog2.f32 %v1027_v40  ;;  %v1031_v42 = vadd.f32 1.0, %v1030_v41  ;;  %vm1034_vm6 = vcmp.lt.f32.partialorder %v1033_v43, 0.0004427343 }
 0x35b   : > { %v1032_v46 = vmul.f32 %v1755_v39, %v1031_v42 }
 0x363   : > { %v1757_v44 = vpop.eup %1756 }
 0x364   : > { %v1029_v45 = vmul.f32 0.6931472, %v1757_v44 }
 0x366   : > { %v1035_v47 = vsel %vm1034_vm6, %v1032_v46, %v1029_v45 }
 0x367   : > { %v1036_v48 = vsel %vm1023_vm7, %v1022_v15, %v1035_v47 }
 0x368   : > { %1758 = vtanh.f32 %v1036_v48 }
 0x372   : > { %v1759_v49 = vpop.eup %1758 }
 0x373   : > { %v1038_v50 = vmul.f32 %v1759_v49, %v1022_v15 }
 0x375   : > { %v1039_v51 = vpack.c.bf16 %v1038_v50, %v1038_v50 }
 0x377   : > { %1627 = vmatmul.mubr.msk.bf16.vlgmr.msra.gmra.mrb[4].mxu0 %vm1120_vm8, %v1039_v51  ;;  %1649 = vmatmul.mubr.msk.bf16.vlgmr.msra.gmra.mrb[8].mxu1 %vm1120_vm8, %v1039_v51 }
 0x378   : > { %1631 = vmatpush3.bf16.msra.mxu0 %v1736_v10  ;;  %1638 = vmatprep.mubr.msk.bf16.mxu0 %vm1832_vm9, %v1825_v3 }
 0x379   : > { %1632 = vmatprep.subr.bf16.mxu0 %v1825_v3 }
 0x37c   : > { %1633 = vmatpush3.bf16.msra.mxu0 %v1737_v52 }
 0x37d   : > { %1634 = vmatprep.subr.bf16.mxu0 %v1825_v3 }
 0x380   : > { %1635 = vmatpush3.bf16.msra.mxu0 %v1738_v57 }
 0x381   : > { %1636 = vmatprep.subr.bf16.mxu0 %v1825_v3 }
 0x384   : > { %1637 = vmatpush3.bf16.msra.mxu0 %v1739_v58 }
 0x385   : > { %1652 = vmatprep.subr.bf16.mxu0 %v1825_v3 }
 0x44a   : > { %v1162_v61 = vpop.f32.mrb[4].mxu0  ;;  %v1315_v62 = vpop.f32.mrb[8].mxu1 }
 0x44b   : > { %v1163_v63 = vadd.f32 %v1162_v61, %v1104_v59  ;;  %v1628_v0 = vpop.f32.mrb[5].mxu0  ;;  %v1650_v1 = vpop.f32.mrb[9].mxu1  ;;  %v1316_v19 = vadd.f32 %v1315_v62, %v1262_v18 }
 0x44c   : > { %v1165_v2 = vpop.f32.mrb[6].mxu0  ;;  %v1318_v4 = vpop.f32.mrb[10].mxu1 }
 0x44d   : > { %v1171_v7 = vrot.slane %v1163_v63, %v1993_v6  ;;  %v1629_v8 = vpop.f32.mrb[7].mxu0  ;;  %v1651_v9 = vpop.f32.mrb[11].mxu1  ;;  %v1324_v22 = vrot.slane %v1316_v19, %v1993_v6 }
 0x44f   : > { %v1172_v11 = vadd.f32 %v1171_v7, %v1094_v5 }
 0x451   : > { %v1173_v13 = vpack.c.bf16 %v1172_v11, %v1172_v11 }
 0x453   : > { %1639 = vmatmul.mubr.msk.bf16.vlgmr.msra.gmra.mrb[8].mxu0 %vm1213_vm10, %v1173_v13 }
 0x454   : > { %1653 = vmatpush3.bf16.msra.mxu0 %v1740_v12  ;;  %1660 = vmatprep.mubr.msk.bf16.mxu0 %vm1832_vm9, %v1825_v3 }
 0x455   : > { %1654 = vmatprep.subr.bf16.mxu0 %v1825_v3 }
 0x458   : > { %1655 = vmatpush3.bf16.msra.mxu0 %v1741_v14 }
 0x459   : > { %1656 = vmatprep.subr.bf16.mxu0 %v1825_v3 }
 0x45c   : > { %1657 = vmatpush3.bf16.msra.mxu0 %v1742_v16 }
 0x45d   : > { %1658 = vmatprep.subr.bf16.mxu0 %v1825_v3 }
 0x460   : > { %1659 = vmatpush3.bf16.msra.mxu0 %v1743_v17 }
 0x526   : > { %v1251_v21 = vpop.f32.mrb[8].mxu0 }
 0x527   : > { %v1252_v23 = vadd.f32 %v1534_v20, %v1251_v21  ;;  %v1640_v3 = vpop.f32.mrb[9].mxu0 }
 0x528   : > { %v1254_v24 = vpop.f32.mrb[10].mxu0 }
 0x529   : > { %v1325_v25 = vadd.f32 %v1324_v22, %v1252_v23  ;;  %v1641_v26 = vpop.f32.mrb[11].mxu0 }
 0x52b   : > { %v1326_v27 = vpack.c.bf16 %v1325_v25, %v1325_v25 }
 0x52d   : > { %1661 = vmatmul.mubr.msk.bf16.vlgmr.msra.gmra.mrb[12].mxu0 %vm1213_vm10, %v1326_v27 }
 0x600   : > { %v1403_v29 = vpop.f32.mrb[12].mxu0 }
 0x601   : > { %v1404_v6 = vadd.f32 %v1544_v28, %v1403_v29  ;;  %v1662_v30 = vpop.f32.mrb[13].mxu0 }
 0x602   : > { %v1406_v31 = vpop.f32.mrb[14].mxu0 }
 0x603   : > { %v1663_v32 = vpop.f32.mrb[15].mxu0  ;;  %1409 = vst.msk [vmem:[%s588_s25] sm:$0xff] %vm827_vm1, %v1404_v6 }
 0x604   : > { %1773 = shalt.err (!%p1770_p3)
}
 0x605   : > { %s1774_s20 = scalar_lea.hbm %s2171_s22, 128  ;;  %s1778_s19 = scalar_lea.hbm %s2232_s18, 256 }
 0x606   : > { %p1775_p4 = scmp.ne.s32.totalorder %s2171_s22, %s1774_s20  ;;  %p1779_p9 = scmp.lt.u32.totalorder %s2171_s22, %s2232_s18 }
 0x607   : > { %p1780_p10 = scmp.lt.u32.totalorder %s1778_s19, %s1774_s20  ;;  %p1782_p12 = scmp.lt.u32.totalorder %s1774_s20, %s2171_s22 }
 0x608   : > { %p1776_p7 = pnand %p1775_p4, %p1969_p5 }
 0x609   : > { %p1781_p11 = por %p1780_p10, %p1779_p9 }
 0x60a   : > { %p1777_p8 = pneg %p1776_p7 }
 0x60b   : > { %p1783_p13 = por %p1782_p12, %p1781_p11 }
 0x60d   : > { %p1784_p0 = pnand %p1783_p13, %p1777_p8 }
 0x60f   : > { %1787 = shalt.err (!%p1784_p0)
}
 0x610   : > { %1668 = dma.vmem_to_hbm [thread:$0]  (%p1969_p5), %s2173_s26, 128, %s2171_s22, %s1411_s0  }
 0x611 PF: > { %p1674_p1 = scmp.ge.s32.totalorder %s1822_s30, 2  ;;  %s1436_s24 = sand.u32 1, %s1810_s27  }
 0x612   : > { %s1437_s1 = scalar_lea.sflag [#allocation3], %s1436_s24 }
 0x613   : > { %p1671_p2 = pnand %p1674_p1, %p1973_p6 }
 0x615   : > { %1805 = dma.done.wait (!%p1671_p2), %s1437_s1, 128  }
 0x616   : > { %1807 = vsyncadd (!%p1671_p2), %s1437_s1, 4294967168  ;;  %s2254_s30 = sld [smem:[#allocation6_spill]]  ;;  %s2255_s3 = sld [smem:[#allocation5_spill]] }
 0x617   : > { %s2256_s29 = sld [smem:[#allocation7_spill]]  ;;  %s2257_s27 = smov %s1814_s28 }
 0x61c   : > { %p28_p3 = scmp.ge.s32.totalorder %s2254_s30, 4   ;;  %s2258_s28 = smov %s2255_s3 }
 0x61e   :  { %30 = sbr.rel (!%p28_p3) target bundleno = 9 (0x9), region = 133 }
 0x625   :  { %1442 = vsyncpa [#allocation3], 1 }
 0x626   :  { %1444 = vsyncpa [#allocation3 + $0x1], 1 }

</bundles_post_ra>
